<compile_context>
chip_gen: v6e
topology: v6e:2x2x1
jax: 0.10.0
libtpu: 0.0.40
codegen_flags: <defaults>
</compile_context>

<pallas_src>
import jax
import jax.numpy as jnp
import numpy as np
from jax.experimental import pallas as pl
from jax.experimental.pallas import tpu as pltpu


def _round_up(x, m):
    return (x + m - 1) // m * m


def _tpr_joint_kernel(jid_ref, w_ref, out_ref):
    """Fused embedding lookup + TPR binder as counts @ W on the MXU.

    Block shapes:
      jid_ref : (TB, S)        int32  joint ids (fid * NR + rid) for this batch tile
      w_ref   : (NJ, FD*RD)    f32    precomputed outer-product table (VMEM-resident)
      out_ref : (TB, FD*RD)    f32    lane-dense flattened TPR
    """
    jids = jid_ref[...]                                   # (TB, S) int32
    tb, s = jids.shape
    nj = w_ref.shape[0]

    # Joint one-hot over the (filler, role) product vocabulary.
    # Layout: S on sublanes, NJ on lanes -> plain VPU compare, no relayout.
    iota = jax.lax.broadcasted_iota(jnp.int32, (tb, s, nj), 2)
    onehot = (jids[:, :, None] == iota).astype(jnp.float32)   # (TB, S, NJ)

    # Reduce over S -> per-batch counts of each (filler, role) pair (XLU reduction).
    counts = jnp.sum(onehot, axis=1)                          # (TB, NJ)

    # Single lane-dense MXU matmul: out[t] = sum_j counts[t, j] * W[j].
    out_ref[...] = jnp.dot(counts, w_ref[...],
                           preferred_element_type=jnp.float32,
                           precision=jax.lax.Precision.HIGHEST)


def _pick_batch_tile(b, s, nj, fdrd, vmem_budget_bytes=8 << 20):
    """Largest batch tile whose per-step VMEM working set fits a conservative
    budget (safe on v5e/v6e/v7x default scoped VMEM).  Prefers >= 2 grid steps
    for large B so the 'parallel' batch axis can be sharded across v7x's 2 TCs."""
    nj_l = _round_up(nj, 128)
    fdrd_l = _round_up(fdrd, 128)

    def block_bytes(tb):
        ids = tb * _round_up(s, 128) * 4            # id block (double-buffered)
        onehot = tb * _round_up(s, 8) * nj_l * 4    # live in-kernel intermediate
        counts = _round_up(tb, 8) * nj_l * 4
        w = _round_up(nj, 8) * fdrd_l * 4           # resident table
        out = tb * fdrd_l * 4                       # output block (double-buffered)
        return 2 * (ids + out) + onehot + counts + w

    divisors = [t for t in range(8, b + 1, 8) if b % t == 0]
    if not divisors:
        return b                                    # small / odd batch: one block
    fitting = [t for t in divisors if block_bytes(t) <= vmem_budget_bytes]
    if not fitting:
        return divisors[0]
    tb = max(fitting)
    if tb == b and b >= 64:                         # keep >= 2 steps for v7x megacore
        halves = [t for t in fitting if t <= b // 2]
        if halves:
            tb = max(halves)
    return tb


def tensor_product_encoder_forward(filler_list, role_list,
                                   filler_embedding, role_embedding):
    """Mirrors TensorProductEncoder.forward for its default configuration
    (no embedder squeeze, binder='tpr', final_layer_width=None).

    filler_list, role_list : (B, S) integer id arrays
    filler_embedding       : (n_fillers, filler_dim) f32 table
    role_embedding         : (n_roles,  role_dim)   f32 table
    returns                : (1, B, filler_dim * role_dim) f32
    """
    b, s = filler_list.shape
    nf, fd = filler_embedding.shape
    nr, rd = role_embedding.shape
    nj = nf * nr
    fdrd = fd * rd

    # Wrapper-side prep (tiny XLA ops, free layout plumbing):
    #   joint id over the (filler, role) product vocabulary, and
    #   W[f*NR + r, :] = flatten(filler_emb[f] outer role_emb[r]).
    jid = filler_list.astype(jnp.int32) * nr + role_list.astype(jnp.int32)   # (B, S)
    w = (filler_embedding.astype(jnp.float32)[:, None, :, None] *
         role_embedding.astype(jnp.float32)[None, :, None, :]).reshape(nj, fdrd)
    # TODO(synk): for very large NF*NR this product table would not fit VMEM; a
    # split-lookup path (onehot_f @ ftab, onehot_r @ rtab, MXU contraction over S)
    # would be needed.  Not required for this module's default parameterization.

    tb = _pick_batch_tile(b, s, nj, fdrd)

    grid_spec = pltpu.PrefetchScalarGridSpec(
        num_scalar_prefetch=0,
        grid=(b // tb,),
        in_specs=[
            pl.BlockSpec((tb, s), lambda i: (i, 0)),       # joint ids, KiB-scale DMA
            pl.BlockSpec((nj, fdrd), lambda i: (0, 0)),    # W table, VMEM-resident
        ],
        out_specs=pl.BlockSpec((tb, fdrd), lambda i: (i, 0)),   # lane-dense output
    )

    out = pl.pallas_call(
        _tpr_joint_kernel,
        out_shape=jax.ShapeDtypeStruct((b, fdrd), jnp.float32),
        grid_spec=grid_spec,
        compiler_params=pltpu.CompilerParams(
            dimension_semantics=("parallel",)),            # batch tiles independent
    )(jid, w)

    # TODO(synk): optional config branches (embedder_squeeze Linear, 'hrr'/'eltwise'
    # binders, final_layer Linear) are not used by the default constructor and are
    # not implemented here.
    # torch: bmm(...).view(B, -1).unsqueeze(0)  ->  free wrapper-side reshape.
    return out[None, :, :]


def _reference_forward(filler_list, role_list, filler_embedding, role_embedding):
    """Pure-JAX reference matching the PyTorch module (default config)."""
    f_emb = jnp.take(filler_embedding, filler_list, axis=0)             # (B, S, FD)
    r_emb = jnp.take(role_embedding, role_list, axis=0)                 # (B, S, RD)
    bound = jnp.sum(f_emb[:, :, :, None] * r_emb[:, :, None, :], axis=1)  # (B, FD, RD)
    b = filler_list.shape[0]
    return bound.reshape(b, -1)[None, :, :]


if __name__ == "__main__":
    # Small shapes consistent with the module's constructor parameters.
    n_fillers = 10
    n_roles = 8
    filler_dim = 8
    role_dim = 16          # filler_dim * role_dim = 128 -> lane-dense flattened TPR
    batch = 8
    seq = 8

    key = jax.random.PRNGKey(0)
    k_ftab, k_rtab, k_fid, k_rid = jax.random.split(key, 4)

    filler_embedding = jax.random.normal(k_ftab, (n_fillers, filler_dim), jnp.float32)
    role_embedding = jax.random.normal(k_rtab, (n_roles, role_dim), jnp.float32)
    filler_list = jax.random.randint(k_fid, (batch, seq), 0, n_fillers, jnp.int32)
    role_list = jax.random.randint(k_rid, (batch, seq), 0, n_roles, jnp.int32)

    out = tensor_product_encoder_forward(filler_list, role_list,
                                         filler_embedding, role_embedding)
    out = jax.block_until_ready(out)

    ref = _reference_forward(filler_list, role_list, filler_embedding, role_embedding)
    np.testing.assert_allclose(np.asarray(out), np.asarray(ref), rtol=1e-5, atol=1e-5)
    assert out.shape == (1, batch, filler_dim * role_dim)
    print("KERNEL_OK")
</pallas_src>

<mosaic_0001>
module attributes {stable_mosaic.version = 11 : i64} {
  func.func @_tpr_joint_kernel(%arg0: i32, %arg1: memref<8x8xi32, #tpu.memory_space<vmem>>, %arg2: memref<80x128xf32, #tpu.memory_space<vmem>>, %arg3: memref<8x128xf32, #tpu.memory_space<vmem>>) attributes {dimension_semantics = [#tpu.dimension_semantics<parallel>], iteration_bounds = array<i64: 1>, scalar_prefetch = 0 : i64, scratch_operands = 0 : i64, tpu.core_type = #tpu.core_type<tc>, window_params = [{transform_indices = @transform_0, window_bounds = array<i64: 8, 8>}, {pipeline_mode = #tpu.pipeline_mode<synchronous>, transform_indices = @transform_1, window_bounds = array<i64: 80, 128>}, {transform_indices = @transform_2, window_bounds = array<i64: 8, 128>}]} {
    %c0 = arith.constant 0 : index
    %c0_0 = arith.constant 0 : index
    %0 = vector.load %arg1[%c0, %c0_0] : memref<8x8xi32, #tpu.memory_space<vmem>>, vector<8x8xi32>
    %1 = tpu.iota {dimensions = array<i32: 2>} : vector<8x8x80xi32>
    %2 = vector.shape_cast %0 : vector<8x8xi32> to vector<8x8x1xi32>
    %3 = vector.broadcast %2 : vector<8x8x1xi32> to vector<8x8x80xi32>
    %4 = arith.cmpi eq, %3, %1 : vector<8x8x80xi32>
    %5 = arith.extui %4 : vector<8x8x80xi1> to vector<8x8x80xi32>
    %6 = arith.sitofp %5 : vector<8x8x80xi32> to vector<8x8x80xf32>
    %cst = arith.constant dense<0.000000e+00> : vector<8x80xf32>
    %7 = vector.multi_reduction <add>, %6, %cst [1] : vector<8x8x80xf32> to vector<8x80xf32>
    %c0_1 = arith.constant 0 : index
    %c0_2 = arith.constant 0 : index
    %8 = vector.load %arg2[%c0_1, %c0_2] : memref<80x128xf32, #tpu.memory_space<vmem>>, vector<80x128xf32>
    %cst_3 = arith.constant dense<0.000000e+00> : vector<8x128xf32>
    %9 = tpu.matmul %7, %8, %cst_3 {dimension_numbers = #tpu.dot_dimension_numbers<[1], [0], [0], [1], [0, 0, 1, 1], [], []>, precision = #tpu.contract_precision<fp32>} : vector<8x80xf32>, vector<80x128xf32>, vector<8x128xf32> -> vector<8x128xf32>
    %c0_4 = arith.constant 0 : index
    %c0_5 = arith.constant 0 : index
    %10 = vector.load %arg3[%c0_4, %c0_5] : memref<8x128xf32, #tpu.memory_space<vmem>>, vector<8x128xf32>
    tpu.vector_store %arg3[%c0_4, %c0_5], %9 {strides = array<i32>} : memref<8x128xf32, #tpu.memory_space<vmem>>, vector<8x128xf32>,
    return
  }
  func.func @transform_0(%arg0: i32) -> (i32, i32) {
    %c0_i32 = arith.constant 0 : i32
    %c0_i32_0 = arith.constant 0 : i32
    return %arg0, %c0_i32 : i32, i32
  }
  func.func @transform_1(%arg0: i32) -> (i32, i32) {
    %c0_i32 = arith.constant 0 : i32
    %c0_i32_0 = arith.constant 0 : i32
    %c0_i32_1 = arith.constant 0 : i32
    return %c0_i32, %c0_i32_0 : i32, i32
  }
  func.func @transform_2(%arg0: i32) -> (i32, i32) {
    %c0_i32 = arith.constant 0 : i32
    %c0_i32_0 = arith.constant 0 : i32
    return %arg0, %c0_i32 : i32, i32
  }
}

</mosaic_0001>

<bundles_post_ra>
// kernel: tpu_custom_call.1
= control target key start
LH: loop header
LB: loop body
LE: loop exit
PB: predicated region body
PF: predicated region fallthrough
CT: control target
= control target key end

     0   :  { %7 = vsyncpa [#allocation3], 0  ;;  %s1357_s0 = inlined_call_operand.hbm [shape: s32[8,8], index: 0, kind: input, shape index: {}]   ;;  %s1358_s1 = inlined_call_operand.hbm [shape: f32[80,128], index: 1, kind: input, shape index: {}]   ;;  %s1359_s2 = inlined_call_operand.hbm [shape: f32[8,128], index: 2, kind: output, shape index: {}]  }
   0x1   :  { %8 = vsyncpa [#allocation6], 0 }
   0x2   :  { %9 = vsyncpa [#allocation4], 0  ;;  %s1077_s9 = smov [#allocation2]   ;;  %s1078_s11 = smov [#allocation5]  }
   0x3   :  { %s16_s10 = sshll.u32 %s1077_s9, 4  ;;  %s25_s12 = sshll.u32 %s1078_s11, 4  ;;  %s17_s10 = int_to_ptr.vmem [resolvable:$true] %s16_s10  ;;  %s26_s12 = int_to_ptr.vmem [resolvable:$true] %s25_s12 }
   0x4   :  { %s1019_s13 = scalar_lea.vmem %s17_s10, 128  ;;  %p1024_p1 = scmp.lt.s32.totalorder %s17_s10, %s17_s10 }
   0x5   :  { %p1020_p0 = scmp.ne.s32.totalorder %s17_s10, %s1019_s13  ;;  %p1025_p2 = scmp.lt.s32.totalorder %s1019_s13, %s1019_s13 }
   0x7   :  { %p1026_p3 = por %p1025_p2, %p1024_p1 }
   0x9   :  { %p1027_p4 = pnand %p1026_p3, %p1020_p0 }
   0xb   :  { %1030 = shalt.err (!%p1027_p4)
}
   0xc   :  { %19 = dma.hbm_to_vmem [thread:$0]  %s1357_s0, 128, %s17_s10, [#allocation3]  }
   0xd   :  { %s1039_s16 = scalar_lea.vmem %s26_s12, 1280  ;;  %p1044_p6 = scmp.lt.s32.totalorder %s26_s12, %s26_s12 }
   0xe   :  { %p1040_p5 = scmp.ne.s32.totalorder %s26_s12, %s1039_s16  ;;  %p1045_p7 = scmp.lt.s32.totalorder %s1039_s16, %s1039_s16 }
  0x10   :  { %p1046_p8 = por %p1045_p7, %p1044_p6 }
  0x12   :  { %p1047_p9 = pnand %p1046_p8, %p1040_p5 }
  0x14   :  { %1050 = shalt.err (!%p1047_p9)
}
  0x15   :  { %s1079_s17 = smov 128   ;;  %s1080_s18 = smov 8  }
  0x16   :  { %31 = dma.hbm_to_vmem [thread:$0]  %s1358_s1, 1280, %s26_s12, [#allocation6], %s1079_s17, %s1079_s17, %s1080_s18  }
  0x17   :  { %1071 = dma.done.wait [#allocation3], 128  }
  0x18   :  { %1072 = vsyncadd [#allocation3], 4294967168 }
  0x19   :  { %1073 = dma.done.wait [#allocation6], 1280  }
  0x1a   :  { %1074 = vsyncadd [#allocation6], 4294966016  ;;  %v39_v0 = vlaneseq  ;;  %v1081_v1 = vmov 0.0   ;;  %v38_v7 = vld [vmem:[#allocation2] sm:$0xff]  ;;  %v187_v8 = vld [vmem:[#allocation5 + $0x48] sm:$0xff]  ;;  %vm1082_vm0 = vmmov 0  }
  0x1b   :  { %889 = vmatprep.subr.mxu1 %v1081_v1  ;;  %866 = vmatprep.subr.mxu0 %v1081_v1  ;;  %v186_v9 = vld [vmem:[#allocation5 + $0x40] sm:$0xff]  ;;  %v185_v12 = vld [vmem:[#allocation5 + $0x38] sm:$0xff]  ;;  %v184_v13 = vld [vmem:[#allocation5 + $0x30] sm:$0xff]  ;;  %v1108_v19 = vand.u32 4294901760, %v187_v8  ;;  %vm121_vm1 = vcmask 654336   ;;  %vm196_vm8 = vcmask 1041409  }
  0x1c   :  { %v42_v2 = vshrl.u32 %v39_v0, 7  ;;  %v183_v18 = vld [vmem:[#allocation5 + $0x28] sm:$0xff]  ;;  %v1110_v20 = vand.u32 4294901760, %v186_v9  ;;  %v1112_v21 = vand.u32 4294901760, %v185_v12  ;;  %v1114_v22 = vand.u32 4294901760, %v184_v13  ;;  %v182_v24 = vld [vmem:[#allocation5 + $0x20] sm:$0xff]  ;;  %909 = vmatprep.mubr.msk.f32.mxu1 %vm1082_vm0, %v1081_v1  ;;  %886 = vmatprep.mubr.msk.f32.mxu0 %vm1082_vm0, %v1081_v1 }
  0x1d   :  { %v1116_v23 = vand.u32 4294901760, %v183_v18  ;;  %v1119_v25 = vsub.f32 %v187_v8, %v1108_v19  ;;  %867 = vmatpush3.msra.mxu0 %v1108_v19  ;;  %v1135_v32 = vand.u32 4294901760, %v182_v24  ;;  %v181_v33 = vld [vmem:[#allocation5 + $0x18] sm:$0xff]  ;;  %v180_v41 = vld [vmem:[#allocation5 + $0x10] sm:$0xff]  ;;  %v179_v48 = vld [vmem:[#allocation5 + $0x8] sm:$0xff]  ;;  %vm198_vm11 = vcmask 1042434  }
  0x1e   :  { %v57_v3 = vsub.s32 2, %v42_v2  ;;  %v43_v4 = vsub.s32 0, %v42_v2  ;;  %v64_v5 = vsub.s32 3, %v42_v2  ;;  %v50_v6 = vsub.s32 1, %v42_v2  ;;  %868 = vmatprep.subr.mxu0 %v1081_v1  ;;  %v178_v57 = vld [vmem:[#allocation5] sm:$0xff]  ;;  %s1083_s0 = smov [#allocation7]  }
  0x1f   :  { %v78_v16 = vsub.s32 5, %v42_v2  ;;  %v71_v17 = vsub.s32 4, %v42_v2  ;;  %v1122_v26 = vsub.f32 %v186_v9, %v1110_v20  ;;  %v1125_v27 = vsub.f32 %v185_v12, %v1112_v21  ;;  %869 = vmatpush3.msra.mxu0 %v1110_v20  ;;  %s782_s1 = sshll.u32 %s1083_s0, 4  ;;  %s783_s1 = int_to_ptr.vmem [resolvable:$true] %s782_s1 }
  0x20   :  { %v58_v10 = vrot.slane %v38_v7, %v57_v3  ;;  %v44_v11 = vrot.slane %v38_v7, %v43_v4  ;;  %v65_v14 = vrot.slane %v38_v7, %v64_v5  ;;  %v51_v15 = vrot.slane %v38_v7, %v50_v6  ;;  %870 = vmatprep.subr.mxu0 %v1081_v1  ;;  %s1051_s21 = scalar_lea.vmem %s783_s1, 128  ;;  %p1056_p11 = scmp.lt.s32.totalorder %s783_s1, %s783_s1 }
  0x21   :  { %v1128_v28 = vsub.f32 %v184_v13, %v1114_v22  ;;  %v92_v29 = vsub.s32 7, %v42_v2  ;;  %v85_v30 = vsub.s32 6, %v42_v2  ;;  %v1132_v31 = vsub.f32 %v183_v18, %v1116_v23  ;;  %871 = vmatpush3.msra.mxu0 %v1112_v21  ;;  %p1052_p10 = scmp.ne.s32.totalorder %s783_s1, %s1051_s21  ;;  %p1057_p12 = scmp.lt.s32.totalorder %s1051_s21, %s1051_s21 }
  0x22   :  { %60 = vbcast.lane.b32.xlu1 %v58_v10, 256  ;;  %46 = vbcast.lane.b32.xlu0 %v44_v11, 256  ;;  %v79_v34 = vrot.slane %v38_v7, %v78_v16  ;;  %v72_v35 = vrot.slane %v38_v7, %v71_v17  ;;  %v312_v36 = vand.u32 4294901760, %v1119_v25  ;;  %v319_v37 = vand.u32 4294901760, %v1122_v26 }
  0x23   :  { %v326_v38 = vand.u32 4294901760, %v1125_v27  ;;  %v333_v39 = vand.u32 4294901760, %v1128_v28  ;;  %v1143_v40 = vsub.f32 %v182_v24, %v1135_v32  ;;  %v1152_v44 = vand.u32 4294901760, %v181_v33  ;;  %872 = vmatprep.subr.mxu0 %v1081_v1  ;;  %p1058_p13 = por %p1057_p12, %p1056_p11 }
  0x24   :  { %v313_v42 = vsub.f32 %v1119_v25, %v312_v36  ;;  %v320_v43 = vsub.f32 %v1122_v26, %v319_v37  ;;  %v1154_v45 = vand.u32 4294901760, %v180_v41  ;;  %v340_v47 = vand.u32 4294901760, %v1132_v31  ;;  %873 = vmatpush3.msra.mxu0 %v1114_v22 }
  0x25   :  { %v327_v46 = vsub.f32 %v1125_v27, %v326_v38  ;;  %v93_v49 = vrot.slane %v38_v7, %v92_v29  ;;  %v86_v50 = vrot.slane %v38_v7, %v85_v30  ;;  %v1162_v52 = vsub.f32 %v181_v33, %v1152_v44  ;;  %874 = vmatprep.subr.mxu0 %v1081_v1  ;;  %p1059_p0 = pnand %p1058_p13, %p1052_p10 }
  0x26   :  { %67 = vbcast.lane.b32.xlu1 %v65_v14, 256  ;;  %53 = vbcast.lane.b32.xlu0 %v51_v15, 256  ;;  %v314_v51 = vand.u32 4294901760, %v313_v42  ;;  %v321_v53 = vand.u32 4294901760, %v320_v43  ;;  %v334_v54 = vsub.f32 %v1128_v28, %v333_v39  ;;  %v347_v55 = vand.u32 4294901760, %v1143_v40 }
  0x27   :  { %v1170_v56 = vsub.f32 %v180_v41, %v1154_v45  ;;  %v1173_v58 = vand.u32 4294901760, %v179_v48  ;;  %v328_v59 = vand.u32 4294901760, %v327_v46  ;;  %v341_v60 = vsub.f32 %v1132_v31, %v340_v47  ;;  %875 = vmatpush3.msra.mxu0 %v1116_v23 }
  0x28   :  { %890 = vmatpush3.msra.mxu1 %v314_v51  ;;  %v354_v61 = vand.u32 4294901760, %v1162_v52  ;;  %v1181_v62 = vand.u32 4294901760, %v178_v57  ;;  %v335_v2 = vand.u32 4294901760, %v334_v54  ;;  %v348_v3 = vsub.f32 %v1143_v40, %v347_v55  ;;  %876 = vmatprep.subr.mxu0 %v1081_v1 }
  0x29   :  { %891 = vmatprep.subr.mxu1 %v1081_v1  ;;  %v1184_v63 = vsub.f32 %v179_v48, %v1173_v58  ;;  %v361_v4 = vand.u32 4294901760, %v1170_v56  ;;  %v342_v6 = vand.u32 4294901760, %v341_v60  ;;  %877 = vmatpush3.msra.mxu0 %v1135_v32  ;;  %v40_v18 = vand.u32 127, %v39_v0 }
  0x2a   :  { %81 = vbcast.lane.b32.xlu1 %v79_v34, 256  ;;  %74 = vbcast.lane.b32.xlu0 %v72_v35, 256  ;;  %v1192_v5 = vsub.f32 %v178_v57, %v1181_v62  ;;  %v355_v7 = vsub.f32 %v1162_v52, %v354_v61  ;;  %v349_v9 = vand.u32 4294901760, %v348_v3  ;;  %vm200_vm12 = vcmask 1043459  }
  0x2b   :  { %892 = vmatpush3.msra.mxu1 %v321_v53  ;;  %v368_v8 = vand.u32 4294901760, %v1184_v63  ;;  %878 = vmatprep.subr.mxu0 %v1081_v1  ;;  %v362_v10 = vsub.f32 %v1170_v56, %v361_v4  ;;  %vm202_vm13 = vcmask 1044484   ;;  %vm204_vm14 = vcmask 1045509  }
  0x2c   :  { %893 = vmatprep.subr.mxu1 %v1081_v1  ;;  %v375_v11 = vand.u32 4294901760, %v1192_v5  ;;  %879 = vmatpush3.msra.mxu0 %v1152_v44  ;;  %v356_v12 = vand.u32 4294901760, %v355_v7  ;;  %vm206_vm15 = vcmask 1046534  }
  0x2d   :  { %894 = vmatpush3.msra.mxu1 %v328_v59  ;;  %v369_v13 = vsub.f32 %v1184_v63, %v368_v8  ;;  %880 = vmatprep.subr.mxu0 %v1081_v1  ;;  %v363_v14 = vand.u32 4294901760, %v362_v10 }
  0x2e   :  { %95 = vbcast.lane.b32.xlu1 %v93_v49, 256  ;;  %88 = vbcast.lane.b32.xlu0 %v86_v50, 256  ;;  %v376_v15 = vsub.f32 %v1192_v5, %v375_v11 }
  0x2f   :  { %895 = vmatprep.subr.mxu1 %v1081_v1  ;;  %881 = vmatpush3.msra.mxu0 %v1154_v45  ;;  %v370_v16 = vand.u32 4294901760, %v369_v13 }
  0x30   :  { %896 = vmatpush3.msra.mxu1 %v335_v2  ;;  %882 = vmatprep.subr.mxu0 %v1081_v1  ;;  %v377_v17 = vand.u32 4294901760, %v376_v15 }
  0x31   :  { %897 = vmatprep.subr.mxu1 %v1081_v1  ;;  %883 = vmatpush3.msra.mxu0 %v1173_v58 }
  0x32   :  { %898 = vmatpush3.msra.mxu1 %v342_v6  ;;  %884 = vmatprep.subr.mxu0 %v1081_v1 }
  0x33   :  { %899 = vmatprep.subr.mxu1 %v1081_v1  ;;  %885 = vmatpush3.msra.mxu0 %v1181_v62 }
  0x34   :  { %900 = vmatpush3.msra.mxu1 %v349_v9  ;;  %912 = vmatprep.subr.mxu0 %v1081_v1 }
  0x35   :  { %901 = vmatprep.subr.mxu1 %v1081_v1 }
  0x36   :  { %902 = vmatpush3.msra.mxu1 %v356_v12 }
  0x37   :  { %903 = vmatprep.subr.mxu1 %v1081_v1 }
  0x38   :  { %904 = vmatpush3.msra.mxu1 %v363_v14 }
  0x39   :  { %905 = vmatprep.subr.mxu1 %v1081_v1 }
  0x3a   :  { %906 = vmatpush3.msra.mxu1 %v370_v16 }
  0x3b   :  { %907 = vmatprep.subr.mxu1 %v1081_v1 }
  0x3c   :  { %908 = vmatpush3.msra.mxu1 %v377_v17 }
  0x3d   :  { %935 = vmatprep.subr.mxu1 %v1081_v1 }
  0x94   :  { %v61_v24 = vpop.permute.xlu1 %60  ;;  %v47_v29 = vpop.permute.xlu0 %46 }
  0x95   :  { %vm99_vm2 = vcmp.eq.s32.totalorder %v61_v24, %v40_v18  ;;  %vm97_vm3 = vcmp.eq.s32.totalorder %v47_v29, %v40_v18 }
  0x96   :  { %v794_v30 = vsel %vm99_vm2, 1.0, %v1081_v1  ;;  %v792_v33 = vsel %vm97_vm3, 1.0, %v1081_v1  ;;  %vm208_vm2 = vcmask 1047559  }
  0x97   :  { %v136_v34 = vsel %vm121_vm1, %v794_v30, 0.0  ;;  %v122_v35 = vsel %vm121_vm1, %v792_v33, 0.0 }
  0x98   :  { %v137_v41 = vrot.slane %v136_v34, 4  ;;  %v123_v42 = vrot.slane %v122_v35, 4  ;;  %v68_v43 = vpop.permute.xlu1 %67  ;;  %v54_v46 = vpop.permute.xlu0 %53 }
  0x99   :  { %vm100_vm4 = vcmp.eq.s32.totalorder %v68_v43, %v40_v18  ;;  %vm98_vm5 = vcmp.eq.s32.totalorder %v54_v46, %v40_v18 }
  0x9a   :  { %v138_v0 = vadd.f32 %v137_v41, %v136_v34  ;;  %v124_v48 = vadd.f32 %v123_v42, %v122_v35  ;;  %v795_v49 = vsel %vm100_vm4, 1.0, %v1081_v1  ;;  %v793_v50 = vsel %vm98_vm5, 1.0, %v1081_v1 }
  0x9b   :  { %v143_v51 = vsel %vm121_vm1, %v795_v49, 0.0  ;;  %v129_v53 = vsel %vm121_vm1, %v793_v50, 0.0 }
  0x9c   :  { %v139_v54 = vrot.slane %v138_v0, 2  ;;  %v125_v57 = vrot.slane %v124_v48, 2  ;;  %v144_v59 = vrot.slane %v143_v51, 4  ;;  %v130_v60 = vrot.slane %v129_v53, 4  ;;  %v82_v2 = vpop.permute.xlu1 %81  ;;  %v75_v3 = vpop.permute.xlu0 %74 }
  0x9d   :  { %vm102_vm6 = vcmp.eq.s32.totalorder %v82_v2, %v40_v18  ;;  %vm101_vm7 = vcmp.eq.s32.totalorder %v75_v3, %v40_v18 }
  0x9e   :  { %v140_v6 = vadd.f32 %v139_v54, %v138_v0  ;;  %v126_v7 = vadd.f32 %v125_v57, %v124_v48  ;;  %v145_v9 = vadd.f32 %v144_v59, %v143_v51  ;;  %v131_v10 = vadd.f32 %v130_v60, %v129_v53 }
  0x9f   :  { %v797_v12 = vsel %vm102_vm6, 1.0, %v1081_v1  ;;  %v796_v13 = vsel %vm101_vm7, 1.0, %v1081_v1 }
  0xa0   :  { %v146_v14 = vrot.slane %v145_v9, 2  ;;  %v132_v15 = vrot.slane %v131_v10, 2  ;;  %v96_v16 = vpop.permute.xlu1 %95  ;;  %v89_v17 = vpop.permute.xlu0 %88  ;;  %v157_v24 = vsel %vm121_vm1, %v797_v12, 0.0  ;;  %v150_v29 = vsel %vm121_vm1, %v796_v13, 0.0 }
  0xa1   :  { %vm104_vm9 = vcmp.eq.s32.totalorder %v96_v16, %v40_v18  ;;  %vm103_vm10 = vcmp.eq.s32.totalorder %v89_v17, %v40_v18  ;;  %v141_v30 = vrot.slane %v140_v6, 1  ;;  %v127_v33 = vrot.slane %v126_v7, 1 }
  0xa2   :  { %v147_v34 = vadd.f32 %v146_v14, %v145_v9  ;;  %v133_v35 = vadd.f32 %v132_v15, %v131_v10  ;;  %v158_v41 = vrot.slane %v157_v24, 4  ;;  %v151_v42 = vrot.slane %v150_v29, 4 }
  0xa3   :  { %v799_v43 = vsel %vm104_vm9, 1.0, %v1081_v1  ;;  %v798_v46 = vsel %vm103_vm10, 1.0, %v1081_v1  ;;  %v142_v54 = vadd.f32 %v141_v30, %v140_v6  ;;  %v128_v57 = vadd.f32 %v127_v33, %v126_v7 }
  0xa4   :  { %v134_v0 = vrot.slane %v133_v35, 1  ;;  %v171_v48 = vsel %vm121_vm1, %v799_v43, 0.0  ;;  %v164_v49 = vsel %vm121_vm1, %v798_v46, 0.0  ;;  %v159_v50 = vadd.f32 %v158_v41, %v157_v24 }
  0xa5   :  { %v152_v51 = vadd.f32 %v151_v42, %v150_v29  ;;  %v172_v53 = vrot.slane %v171_v48, 4  ;;  %v165_v18 = vrot.slane %v164_v49, 4  ;;  %v148_v59 = vrot.slane %v147_v34, 1 }
  0xa6   :  { %v135_v60 = vadd.f32 %v134_v0, %v133_v35  ;;  %v160_v2 = vrot.slane %v159_v50, 2 }
  0xa7   :  { %v153_v3 = vrot.slane %v152_v51, 2  ;;  %v173_v9 = vadd.f32 %v172_v53, %v171_v48  ;;  %v166_v10 = vadd.f32 %v165_v18, %v164_v49  ;;  %v149_v17 = vadd.f32 %v148_v59, %v147_v34 }
  0xa8   :  { %v197_v12 = vsel %vm196_vm8, %v135_v60, %v128_v57  ;;  %v161_v14 = vadd.f32 %v160_v2, %v159_v50 }
  0xa9   :  { %v199_v13 = vsel %vm198_vm11, %v142_v54, %v197_v12  ;;  %v154_v15 = vadd.f32 %v153_v3, %v152_v51  ;;  %v174_v16 = vrot.slane %v173_v9, 2  ;;  %v167_v24 = vrot.slane %v166_v10, 2 }
  0xaa   :  { %v162_v29 = vrot.slane %v161_v14, 1  ;;  %v201_v7 = vsel %vm200_vm12, %v149_v17, %v199_v13 }
  0xab   :  { %v155_v41 = vrot.slane %v154_v15, 1  ;;  %v175_v6 = vadd.f32 %v174_v16, %v173_v9  ;;  %v168_v30 = vadd.f32 %v167_v24, %v166_v10 }
  0xac   :  { %v163_v33 = vadd.f32 %v162_v29, %v161_v14 }
  0xad   :  { %v156_v35 = vadd.f32 %v155_v41, %v154_v15  ;;  %v176_v42 = vrot.slane %v175_v6, 1  ;;  %v169_v43 = vrot.slane %v168_v30, 1 }
  0xaf   :  { %v203_v46 = vsel %vm202_vm13, %v156_v35, %v201_v7  ;;  %v177_v0 = vadd.f32 %v176_v42, %v175_v6  ;;  %v170_v48 = vadd.f32 %v169_v43, %v168_v30 }
  0xb0   :  { %v205_v49 = vsel %vm204_vm14, %v163_v33, %v203_v46 }
  0xb1   :  { %v207_v50 = vsel %vm206_vm15, %v170_v48, %v205_v49 }
  0xb2   :  { %v209_v34 = vsel %vm208_vm2, %v177_v0, %v207_v50 }
  0xb3   :  { %v210_v51 = vsel %vm121_vm1, %v209_v34, 0 }
  0xb4   :  { %v1252_v53 = vand.u32 4294901760, %v210_v51 }
  0xb6   :  { %910 = vmatmul.mubr.f32.vlgmr.msra.gmra.mxu1 %v1252_v53  ;;  %v288_v18 = vsub.f32 %v210_v51, %v1252_v53 }
  0xb7   :  { %936 = vmatpush3.msra.mxu1 %v1108_v19  ;;  %955 = vmatprep.mubr.msk.f32.mxu1 %vm1082_vm0, %v1081_v1 }
  0xb8   :  { %937 = vmatprep.subr.mxu1 %v1081_v1  ;;  %v289_v54 = vand.u32 4294901760, %v288_v18 }
  0xb9   :  { %938 = vmatpush3.msra.mxu1 %v1110_v20 }
  0xba   :  { %939 = vmatprep.subr.mxu1 %v1081_v1  ;;  %v290_v57 = vsub.f32 %v288_v18, %v289_v54 }
  0xbb   :  { %940 = vmatpush3.msra.mxu1 %v1112_v21 }
  0xbc   :  { %941 = vmatprep.subr.mxu1 %v1081_v1  ;;  %v291_v59 = vand.u32 4294901760, %v290_v57 }
  0xbd   :  { %942 = vmatpush3.msra.mxu1 %v1114_v22 }
  0xbe   :  { %943 = vmatprep.subr.mxu1 %v1081_v1  ;;  %887 = vmatmul.mubr.f32.vlgmr.msra.gmra.mxu0 %v291_v59 }
  0xbf   :  { %913 = vmatpush3.msra.mxu0 %v1119_v25  ;;  %944 = vmatpush3.msra.mxu1 %v1116_v23 }
  0xc0   :  { %914 = vmatprep.subr.mxu0 %v1081_v1  ;;  %945 = vmatprep.subr.mxu1 %v1081_v1 }
  0xc1   :  { %915 = vmatpush3.msra.mxu0 %v1122_v26  ;;  %946 = vmatpush3.msra.mxu1 %v1135_v32 }
  0xc2   :  { %916 = vmatprep.subr.mxu0 %v1081_v1  ;;  %947 = vmatprep.subr.mxu1 %v1081_v1 }
  0xc3   :  { %917 = vmatpush3.msra.mxu0 %v1125_v27  ;;  %948 = vmatpush3.msra.mxu1 %v1152_v44 }
  0xc4   :  { %918 = vmatprep.subr.mxu0 %v1081_v1  ;;  %949 = vmatprep.subr.mxu1 %v1081_v1 }
  0xc5   :  { %919 = vmatpush3.msra.mxu0 %v1128_v28  ;;  %950 = vmatpush3.msra.mxu1 %v1154_v45 }
  0xc6   :  { %920 = vmatprep.subr.mxu0 %v1081_v1  ;;  %951 = vmatprep.subr.mxu1 %v1081_v1 }
  0xc7   :  { %921 = vmatpush3.msra.mxu0 %v1132_v31  ;;  %952 = vmatpush3.msra.mxu1 %v1173_v58 }
  0xc8   :  { %922 = vmatprep.subr.mxu0 %v1081_v1  ;;  %953 = vmatprep.subr.mxu1 %v1081_v1 }
  0xc9   :  { %923 = vmatpush3.msra.mxu0 %v1143_v40  ;;  %954 = vmatpush3.msra.mxu1 %v1181_v62 }
  0xca   :  { %924 = vmatprep.subr.mxu0 %v1081_v1  ;;  %956 = vmatmul.mubr.f32.vlgmr.msra.gmra.mxu1 %v289_v54 }
  0xcb   :  { %981 = vmatprep.subr.mxu1 %v1081_v1  ;;  %925 = vmatpush3.msra.mxu0 %v1162_v52 }
  0xcc   :  { %982 = vmatpush3.msra.mxu1 %v1108_v19  ;;  %926 = vmatprep.subr.mxu0 %v1081_v1 }
  0xcd   :  { %983 = vmatprep.subr.mxu1 %v1081_v1  ;;  %927 = vmatpush3.msra.mxu0 %v1170_v56 }
  0xce   :  { %984 = vmatpush3.msra.mxu1 %v1110_v20  ;;  %928 = vmatprep.subr.mxu0 %v1081_v1 }
  0xcf   :  { %985 = vmatprep.subr.mxu1 %v1081_v1  ;;  %929 = vmatpush3.msra.mxu0 %v1184_v63 }
  0xd0   :  { %986 = vmatpush3.msra.mxu1 %v1112_v21  ;;  %930 = vmatprep.subr.mxu0 %v1081_v1 }
  0xd1   :  { %987 = vmatprep.subr.mxu1 %v1081_v1  ;;  %931 = vmatpush3.msra.mxu0 %v1192_v5 }
  0xd2   :  { %932 = vmatprep.mubr.msk.f32.mxu0 %vm1082_vm0, %v1081_v1  ;;  %988 = vmatpush3.msra.mxu1 %v1114_v22 }
  0xd3   :  { %933 = vmatmul.mubr.f32.vlgmr.msra.gmra.mxu0 %v288_v18  ;;  %958 = vmatprep.subr.mxu0 %v1081_v1 }
  0xd4   :  { %989 = vmatprep.subr.mxu1 %v1081_v1  ;;  %959 = vmatpush3.msra.mxu0 %v312_v36 }
  0xd5   :  { %990 = vmatpush3.msra.mxu1 %v1116_v23  ;;  %960 = vmatprep.subr.mxu0 %v1081_v1 }
  0xd6   :  { %991 = vmatprep.subr.mxu1 %v1081_v1  ;;  %961 = vmatpush3.msra.mxu0 %v319_v37 }
  0xd7   :  { %992 = vmatpush3.msra.mxu1 %v1135_v32  ;;  %962 = vmatprep.subr.mxu0 %v1081_v1 }
  0xd8   :  { %993 = vmatprep.subr.mxu1 %v1081_v1  ;;  %963 = vmatpush3.msra.mxu0 %v326_v38 }
  0xd9   :  { %994 = vmatpush3.msra.mxu1 %v1152_v44  ;;  %964 = vmatprep.subr.mxu0 %v1081_v1 }
  0xda   :  { %995 = vmatprep.subr.mxu1 %v1081_v1  ;;  %965 = vmatpush3.msra.mxu0 %v333_v39 }
  0xdb   :  { %996 = vmatpush3.msra.mxu1 %v1154_v45  ;;  %966 = vmatprep.subr.mxu0 %v1081_v1 }
  0xdc   :  { %997 = vmatprep.subr.mxu1 %v1081_v1  ;;  %967 = vmatpush3.msra.mxu0 %v340_v47 }
  0xdd   :  { %998 = vmatpush3.msra.mxu1 %v1173_v58  ;;  %968 = vmatprep.subr.mxu0 %v1081_v1 }
  0xde   :  { %999 = vmatprep.subr.mxu1 %v1081_v1  ;;  %969 = vmatpush3.msra.mxu0 %v347_v55 }
  0xdf   :  { %1000 = vmatpush3.msra.mxu1 %v1181_v62  ;;  %1001 = vmatprep.mubr.msk.f32.mxu1 %vm1082_vm0, %v1081_v1 }
  0xe0   :  { %970 = vmatprep.subr.mxu0 %v1081_v1  ;;  %1002 = vmatmul.mubr.f32.vlgmr.msra.gmra.mxu1 %v1252_v53 }
  0xe1   :  { %971 = vmatpush3.msra.mxu0 %v354_v61  ;;  %978 = vmatprep.mubr.msk.f32.mxu0 %vm1082_vm0, %v1081_v1 }
  0xe2   :  { %972 = vmatprep.subr.mxu0 %v1081_v1 }
  0xe3   :  { %973 = vmatpush3.msra.mxu0 %v361_v4 }
  0xe4   :  { %974 = vmatprep.subr.mxu0 %v1081_v1 }
  0xe5   :  { %975 = vmatpush3.msra.mxu0 %v368_v8 }
  0xe6   :  { %976 = vmatprep.subr.mxu0 %v1081_v1 }
  0xe7   :  { %977 = vmatpush3.msra.mxu0 %v375_v11 }
  0xe8   :  { %979 = vmatmul.mubr.f32.vlgmr.msra.gmra.mxu0 %v1252_v53 }
 0x176   :  { %v414_v19 = vpop.f32.mrf.mxu1 }
 0x178   :  { %v911_v20 = vpop.f32.mrf.mxu1 }
 0x17e   :  { %v293_v21 = vpop.f32.mrf.mxu0 }
 0x17f   :  { %v415_v31 = vadd.f32 %v414_v19, %v293_v21 }
 0x180   :  { %v888_v22 = vpop.f32.mrf.mxu0 }
 0x18a   :  { %v589_v23 = vpop.f32.mrf.mxu1 }
 0x18c   :  { %v957_v25 = vpop.f32.mrf.mxu1 }
 0x193   :  { %v506_v26 = vpop.f32.mrf.mxu0 }
 0x194   :  { %v507_v36 = vadd.f32 %v506_v26, %v415_v31 }
 0x195   :  { %v934_v27 = vpop.f32.mrf.mxu0 }
 0x196   :  { %v590_v37 = vadd.f32 %v589_v23, %v507_v36 }
 0x1a0   :  { %v771_v28 = vpop.f32.mrf.mxu1 }
 0x1a2   :  { %v1003_v32 = vpop.f32.mrf.mxu1 }
 0x1a8   :  { %v690_v38 = vpop.f32.mrf.mxu0 }
 0x1a9   :  { %v691_v1 = vadd.f32 %v690_v38, %v590_v37 }
 0x1aa   :  { %v980_v39 = vpop.f32.mrf.mxu0 }
 0x1ab   :  { %v772_v40 = vadd.f32 %v771_v28, %v691_v1 }
 0x1ad   :  { %775 = vst [vmem:[#allocation7] sm:$0xff] %v772_v40 }
 0x1ae   :  { %1062 = shalt.err (!%p1059_p0)
}
 0x1af   :  { %785 = dma.vmem_to_hbm [thread:$0]  %s783_s1, 128, %s1359_s2, [#allocation4]  }
 0x1b0   :  { %1075 = dma.done.wait [#allocation4], 128  }
 0x1b1   :  { %1076 = vsyncadd [#allocation4], 4294967168 }
 0x1b2   :  { %789 = vsyncpa [#allocation3], 1 }
 0x1b3   :  { %790 = vsyncpa [#allocation6], 1 }
 0x1b4   :  { %791 = vsyncpa [#allocation4], 1 }

</bundles_post_ra>
